<compile_context>
chip_gen: v5e
topology: v5e:2x2
jax: 0.10.0
libtpu: 0.0.40
codegen_flags: <defaults>
</compile_context>

<pallas_src>
import jax
import jax.numpy as jnp
from jax.experimental import pallas as pl
from jax.experimental.pallas import tpu as pltpu


_LANE = 128


def _round_up(v, m):
    return (v + m - 1) // m * m


def _encoder_kernel(x_ref, w1_ref, w234_ref, b_ref, w5_ref, b5_ref, out_ref):
    tb, n, x_dim = x_ref.shape
    d_pad = w1_ref.shape[1]
    mm_dtype = w234_ref.dtype                                # bf16 (MXU) or f32

    x = x_ref[...].astype(jnp.float32)                       # (TB, N, x_dim)

    # --- MaxBlock 1: per-set max subtract, linear, tanh ----------------------
    xm = jnp.max(x, axis=1, keepdims=True)                   # (TB, 1, x_dim)
    xc = x - xm                                              # (TB, N, x_dim)
    if x_dim <= 8:
        # K is tiny: rank-1 VPU updates instead of a lane-sparse MXU matmul.
        w1 = w1_ref[...]                                     # (x_dim, d_pad) f32
        acc = xc[:, :, 0:1] * w1[0]
        for k in range(1, x_dim):
            acc = acc + xc[:, :, k:k + 1] * w1[k]
        h = jnp.tanh(acc + b_ref[0, :]).reshape(tb * n, d_pad)
    else:
        h = jnp.tanh(
            jnp.dot(xc.reshape(tb * n, x_dim), w1_ref[...],
                    preferred_element_type=jnp.float32) + b_ref[0, :])

    # --- MaxBlocks 2 & 3 (bf16 MXU operands, f32 accumulation) ----------------
    for i in range(2):
        h3 = h.reshape(tb, n, d_pad)                         # per-set view
        hm = jnp.max(h3, axis=1, keepdims=True)              # (TB, 1, d_pad)
        hc = (h3 - hm).reshape(tb * n, d_pad).astype(mm_dtype)
        h = jnp.tanh(
            jnp.dot(hc, w234_ref[i], preferred_element_type=jnp.float32)
            + b_ref[i + 1, :])                               # (TB*N, d_pad) f32

    # --- max-pool over points, then the 2-layer "ro" MLP ----------------------
    pooled = jnp.max(h.reshape(tb, n, d_pad), axis=1)        # (TB, d_pad) f32
    y = jnp.tanh(
        jnp.dot(pooled.astype(mm_dtype), w234_ref[2],
                preferred_element_type=jnp.float32) + b_ref[3, :])
    z = (jnp.dot(y.astype(mm_dtype), w5_ref[...],
                 preferred_element_type=jnp.float32) + b5_ref[...])
    out_ref[...] = z.astype(out_ref.dtype)


def encoder_forward(x, params, *, tb=None, use_bf16=True):
    """x: (B, N, x_dim) float32.  params: dict of (in, out) weights + biases."""
    B, N0, x_dim = x.shape
    d_dim = params["w1"].shape[1]
    z1_dim = params["w5"].shape[1]
    d_pad = _round_up(d_dim, _LANE)
    z_pad = _round_up(z1_dim, _LANE)
    mm_dtype = jnp.bfloat16 if use_bf16 else jnp.float32

    # ---- replicate-pad the point dim to a multiple of 8 ----------------------
    # Duplicating a real point is exact for every max reduction (per-set max
    # subtract and the final pooling); zero-padding would NOT be.
    N = _round_up(N0, 8)
    if N != N0:
        x = jnp.concatenate(
            [x, jnp.broadcast_to(x[:, N0 - 1:N0, :], (B, N - N0, x_dim))],
            axis=1)

    # ---- choose the batch tile TB --------------------------------------------
    if tb is None:
        # Target ~2048 matmul rows per grid step, capped by a VMEM budget that
        # counts ~4 live f32 (TB*N, d_pad) activation arrays plus the
        # lane-padded (128-wide), double-buffered x input block.
        target_rows = 2048
        tb = max(1, min(B, pl.cdiv(target_rows, N)))
        per_row_bytes = 4 * d_pad * 4 + 2 * _LANE * 4
        max_rows = max(1, (24 * 1024 * 1024) // per_row_bytes)
        tb = max(1, min(tb, max(1, max_rows // max(N, 1))))
        if B >= 16:
            # v7x megacore: keep >= 2 sublane-aligned grid blocks so both
            # TensorCores get work (neutral on v5e / v6e).
            tb = min(tb, max(8, (B // 2) // 8 * 8))
    if B > tb and tb % 8 != 0:
        tb = _round_up(tb, 8)                                # sublane-aligned tiles
    B_pad = _round_up(B, tb)
    n_blocks = B_pad // tb

    # ---- pad inputs / params to lane-dense shapes (zero padding is exact) ----
    xp = x if B_pad == B else jnp.pad(x, ((0, B_pad - B), (0, 0), (0, 0)))

    def pad2(a, r, c, dt=jnp.float32):
        return jnp.pad(a, ((0, r - a.shape[0]), (0, c - a.shape[1]))).astype(dt)

    w1 = pad2(params["w1"], x_dim, d_pad)                    # (x_dim, d_pad) f32
    w234 = jnp.stack([pad2(params[k], d_pad, d_pad, mm_dtype)
                      for k in ("w2", "w3", "w4")])          # (3, d_pad, d_pad)
    b1234 = jnp.stack([jnp.pad(params[k].reshape(-1), (0, d_pad - d_dim))
                       for k in ("b1", "b2", "b3", "b4")])   # (4, d_pad) f32
    w5 = pad2(params["w5"], d_pad, z_pad, mm_dtype)          # (d_pad, z_pad)
    b5 = jnp.pad(params["b5"].reshape(1, -1),
                 ((0, 0), (0, z_pad - z1_dim)))              # (1, z_pad) f32

    grid_spec = pltpu.PrefetchScalarGridSpec(
        num_scalar_prefetch=0,
        grid=(n_blocks,),
        in_specs=[
            pl.BlockSpec((tb, N, x_dim), lambda b: (b, 0, 0)),
            pl.BlockSpec((x_dim, d_pad), lambda b: (0, 0)),
            pl.BlockSpec((3, d_pad, d_pad), lambda b: (0, 0, 0)),
            pl.BlockSpec((4, d_pad), lambda b: (0, 0)),
            pl.BlockSpec((d_pad, z_pad), lambda b: (0, 0)),
            pl.BlockSpec((1, z_pad), lambda b: (0, 0)),
        ],
        out_specs=pl.BlockSpec((tb, z_pad), lambda b: (b, 0)),
    )

    out = pl.pallas_call(
        _encoder_kernel,
        out_shape=jax.ShapeDtypeStruct((B_pad, z_pad), jnp.float32),
        grid_spec=grid_spec,
        compiler_params=pltpu.CompilerParams(
            dimension_semantics=("parallel",),                # v7x: 2 TCs
            vmem_limit_bytes=48 * 1024 * 1024),               # explicit, <=48MiB
    )(xp, w1, w234, b1234, w5, b5)

    return out[:B, :z1_dim]


def init_params(key, x_dim, d_dim, z1_dim):
    """Deterministic parameter init.  Weights stored as (in_dim, out_dim)
    (i.e. already transposed relative to torch.nn.Linear.weight)."""
    keys = jax.random.split(key, 10)

    def lin(kw, kb, din, dout):
        bound = 1.0 / jnp.sqrt(din)
        w = jax.random.uniform(kw, (din, dout), jnp.float32, -bound, bound)
        b = jax.random.uniform(kb, (dout,), jnp.float32, -bound, bound)
        return w, b

    p = {}
    p["w1"], p["b1"] = lin(keys[0], keys[1], x_dim, d_dim)
    p["w2"], p["b2"] = lin(keys[2], keys[3], d_dim, d_dim)
    p["w3"], p["b3"] = lin(keys[4], keys[5], d_dim, d_dim)
    p["w4"], p["b4"] = lin(keys[6], keys[7], d_dim, d_dim)
    p["w5"], p["b5"] = lin(keys[8], keys[9], d_dim, z1_dim)
    return p


def encoder_reference(x, p):
    """Pure-JAX reference mirroring the PyTorch module, for verification."""
    def maxblock(h, w, b):
        hm = jnp.max(h, axis=1, keepdims=True)
        return jnp.einsum("bnd,de->bne", h - hm, w,
                          preferred_element_type=jnp.float32) + b

    h = jnp.tanh(maxblock(x, p["w1"], p["b1"]))
    h = jnp.tanh(maxblock(h, p["w2"], p["b2"]))
    h = jnp.tanh(maxblock(h, p["w3"], p["b3"]))
    pooled = jnp.max(h, axis=1)                              # (B, d_dim)
    y = jnp.tanh(pooled @ p["w4"] + p["b4"])
    return y @ p["w5"] + p["b5"]


if __name__ == "__main__":
    B, N = 2, 10         # batch, num points (N=10 exercises the replicate pad)
    x_dim, d_dim, z1_dim = 3, 32, 16

    key = jax.random.PRNGKey(0)
    k_x, k_p = jax.random.split(key)
    x = jax.random.normal(k_x, (B, N, x_dim), jnp.float32)
    params = init_params(k_p, x_dim, d_dim, z1_dim)

    z1_ref = encoder_reference(x, params)

    # f32 path: tight numerics check against the pure-JAX reference.
    z1_f32 = encoder_forward(x, params, use_bf16=False)
    jax.block_until_ready(z1_f32)
    assert z1_f32.shape == (B, z1_dim)
    err_f32 = jnp.max(jnp.abs(z1_f32 - z1_ref))
    assert jnp.allclose(z1_f32, z1_ref, atol=1e-4, rtol=1e-4), (
        f"f32 mismatch: max abs diff {err_f32}")

    # bf16-MXU path (default / fast): looser tolerance due to bf16 operands.
    z1 = encoder_forward(x, params)
    jax.block_until_ready(z1)
    assert z1.shape == (B, z1_dim)
    err_bf16 = jnp.max(jnp.abs(z1 - z1_ref))
    assert jnp.allclose(z1, z1_ref, atol=5e-2, rtol=5e-2), (
        f"bf16 mismatch: max abs diff {err_bf16}")

    print("KERNEL_OK")
</pallas_src>

<mosaic_0001>
module attributes {stable_mosaic.version = 11 : i64} {
  func.func @_encoder_kernel(%arg0: i32, %arg1: memref<2x16x3xf32, #tpu.memory_space<vmem>>, %arg2: memref<3x128xf32, #tpu.memory_space<vmem>>, %arg3: memref<3x128x128xf32, #tpu.memory_space<vmem>>, %arg4: memref<4x128xf32, #tpu.memory_space<vmem>>, %arg5: memref<128x128xf32, #tpu.memory_space<vmem>>, %arg6: memref<1x128xf32, #tpu.memory_space<vmem>>, %arg7: memref<2x128xf32, #tpu.memory_space<vmem>>) attributes {dimension_semantics = [#tpu.dimension_semantics<parallel>], iteration_bounds = array<i64: 1>, scalar_prefetch = 0 : i64, scratch_operands = 0 : i64, tpu.core_type = #tpu.core_type<tc>, window_params = [{transform_indices = @transform_0, window_bounds = array<i64: 2, 16, 3>}, {pipeline_mode = #tpu.pipeline_mode<synchronous>, transform_indices = @transform_1, window_bounds = array<i64: 3, 128>}, {pipeline_mode = #tpu.pipeline_mode<synchronous>, transform_indices = @transform_2, window_bounds = array<i64: 3, 128, 128>}, {pipeline_mode = #tpu.pipeline_mode<synchronous>, transform_indices = @transform_3, window_bounds = array<i64: 4, 128>}, {pipeline_mode = #tpu.pipeline_mode<synchronous>, transform_indices = @transform_4, window_bounds = array<i64: 128, 128>}, {pipeline_mode = #tpu.pipeline_mode<synchronous>, transform_indices = @transform_5, window_bounds = array<i64: 1, 128>}, {transform_indices = @transform_6, window_bounds = array<i64: 2, 128>}]} {
    %c0 = arith.constant 0 : index
    %c0_0 = arith.constant 0 : index
    %c0_1 = arith.constant 0 : index
    %0 = vector.load %arg1[%c0, %c0_0, %c0_1] : memref<2x16x3xf32, #tpu.memory_space<vmem>>, vector<2x16x3xf32>
    %cst = arith.constant dense<0xFF800000> : vector<2x3xf32>
    %1 = vector.multi_reduction <maximumf>, %0, %cst [1] : vector<2x16x3xf32> to vector<2x3xf32>
    %2 = vector.shape_cast %1 : vector<2x3xf32> to vector<2x1x3xf32>
    %3 = vector.broadcast %2 : vector<2x1x3xf32> to vector<2x16x3xf32>
    %4 = arith.subf %0, %3 : vector<2x16x3xf32>
    %c0_2 = arith.constant 0 : index
    %c0_3 = arith.constant 0 : index
    %5 = vector.load %arg2[%c0_2, %c0_3] : memref<3x128xf32, #tpu.memory_space<vmem>>, vector<3x128xf32>
    %6 = vector.extract_strided_slice %4 {offsets = [0, 0, 0], sizes = [2, 16, 1], strides = [1, 1, 1]} : vector<2x16x3xf32> to vector<2x16x1xf32>
    %7 = vector.extract_strided_slice %5 {offsets = [0, 0], sizes = [1, 128], strides = [1, 1]} : vector<3x128xf32> to vector<1x128xf32>
    %8 = vector.shape_cast %7 : vector<1x128xf32> to vector<128xf32>
    %9 = vector.shape_cast %8 : vector<128xf32> to vector<1x1x128xf32>
    %10 = vector.broadcast %6 : vector<2x16x1xf32> to vector<2x16x128xf32>
    %11 = vector.broadcast %9 : vector<1x1x128xf32> to vector<2x16x128xf32>
    %12 = arith.mulf %10, %11 : vector<2x16x128xf32>
    %13 = vector.extract_strided_slice %4 {offsets = [0, 0, 1], sizes = [2, 16, 1], strides = [1, 1, 1]} : vector<2x16x3xf32> to vector<2x16x1xf32>
    %14 = vector.extract_strided_slice %5 {offsets = [1, 0], sizes = [1, 128], strides = [1, 1]} : vector<3x128xf32> to vector<1x128xf32>
    %15 = vector.shape_cast %14 : vector<1x128xf32> to vector<128xf32>
    %16 = vector.shape_cast %15 : vector<128xf32> to vector<1x1x128xf32>
    %17 = vector.broadcast %13 : vector<2x16x1xf32> to vector<2x16x128xf32>
    %18 = vector.broadcast %16 : vector<1x1x128xf32> to vector<2x16x128xf32>
    %19 = arith.mulf %17, %18 : vector<2x16x128xf32>
    %20 = arith.addf %12, %19 : vector<2x16x128xf32>
    %21 = vector.extract_strided_slice %4 {offsets = [0, 0, 2], sizes = [2, 16, 1], strides = [1, 1, 1]} : vector<2x16x3xf32> to vector<2x16x1xf32>
    %22 = vector.extract_strided_slice %5 {offsets = [2, 0], sizes = [1, 128], strides = [1, 1]} : vector<3x128xf32> to vector<1x128xf32>
    %23 = vector.shape_cast %22 : vector<1x128xf32> to vector<128xf32>
    %24 = vector.shape_cast %23 : vector<128xf32> to vector<1x1x128xf32>
    %25 = vector.broadcast %21 : vector<2x16x1xf32> to vector<2x16x128xf32>
    %26 = vector.broadcast %24 : vector<1x1x128xf32> to vector<2x16x128xf32>
    %27 = arith.mulf %25, %26 : vector<2x16x128xf32>
    %28 = arith.addf %20, %27 : vector<2x16x128xf32>
    %c0_4 = arith.constant 0 : index
    %c0_5 = arith.constant 0 : index
    %29 = vector.load %arg4[%c0_4, %c0_5] : memref<4x128xf32, #tpu.memory_space<vmem>>, vector<1x128xf32>
    %30 = vector.shape_cast %29 : vector<1x128xf32> to vector<128xf32>
    %31 = vector.shape_cast %30 : vector<128xf32> to vector<1x1x128xf32>
    %32 = vector.broadcast %31 : vector<1x1x128xf32> to vector<2x16x128xf32>
    %33 = arith.addf %28, %32 : vector<2x16x128xf32>
    %34 = math.tanh %33 : vector<2x16x128xf32>
    %35 = vector.shape_cast %34 : vector<2x16x128xf32> to vector<32x128xf32>
    %36 = vector.shape_cast %35 : vector<32x128xf32> to vector<2x16x128xf32>
    %cst_6 = arith.constant dense<0xFF800000> : vector<2x128xf32>
    %37 = vector.multi_reduction <maximumf>, %36, %cst_6 [1] : vector<2x16x128xf32> to vector<2x128xf32>
    %38 = vector.shape_cast %37 : vector<2x128xf32> to vector<2x1x128xf32>
    %39 = vector.broadcast %38 : vector<2x1x128xf32> to vector<2x16x128xf32>
    %40 = arith.subf %36, %39 : vector<2x16x128xf32>
    %41 = vector.shape_cast %40 : vector<2x16x128xf32> to vector<32x128xf32>
    %c0_7 = arith.constant 0 : index
    %c0_8 = arith.constant 0 : index
    %c0_9 = arith.constant 0 : index
    %42 = vector.load %arg3[%c0_7, %c0_8, %c0_9] : memref<3x128x128xf32, #tpu.memory_space<vmem>>, vector<1x128x128xf32>
    %43 = vector.shape_cast %42 : vector<1x128x128xf32> to vector<128x128xf32>
    %cst_10 = arith.constant dense<0.000000e+00> : vector<32x128xf32>
    %44 = tpu.matmul %41, %43, %cst_10 {dimension_numbers = #tpu.dot_dimension_numbers<[1], [0], [0], [1], [0, 0, 1, 1], [], []>} : vector<32x128xf32>, vector<128x128xf32>, vector<32x128xf32> -> vector<32x128xf32>
    %c1 = arith.constant 1 : index
    %c0_11 = arith.constant 0 : index
    %45 = vector.load %arg4[%c1, %c0_11] : memref<4x128xf32, #tpu.memory_space<vmem>>, vector<1x128xf32>
    %46 = vector.shape_cast %45 : vector<1x128xf32> to vector<128xf32>
    %47 = vector.shape_cast %46 : vector<128xf32> to vector<1x128xf32>
    %48 = vector.broadcast %47 : vector<1x128xf32> to vector<32x128xf32>
    %49 = arith.addf %44, %48 : vector<32x128xf32>
    %50 = math.tanh %49 : vector<32x128xf32>
    %51 = vector.shape_cast %50 : vector<32x128xf32> to vector<2x16x128xf32>
    %cst_12 = arith.constant dense<0xFF800000> : vector<2x128xf32>
    %52 = vector.multi_reduction <maximumf>, %51, %cst_12 [1] : vector<2x16x128xf32> to vector<2x128xf32>
    %53 = vector.shape_cast %52 : vector<2x128xf32> to vector<2x1x128xf32>
    %54 = vector.broadcast %53 : vector<2x1x128xf32> to vector<2x16x128xf32>
    %55 = arith.subf %51, %54 : vector<2x16x128xf32>
    %56 = vector.shape_cast %55 : vector<2x16x128xf32> to vector<32x128xf32>
    %c1_13 = arith.constant 1 : index
    %c0_14 = arith.constant 0 : index
    %c0_15 = arith.constant 0 : index
    %57 = vector.load %arg3[%c1_13, %c0_14, %c0_15] : memref<3x128x128xf32, #tpu.memory_space<vmem>>, vector<1x128x128xf32>
    %58 = vector.shape_cast %57 : vector<1x128x128xf32> to vector<128x128xf32>
    %cst_16 = arith.constant dense<0.000000e+00> : vector<32x128xf32>
    %59 = tpu.matmul %56, %58, %cst_16 {dimension_numbers = #tpu.dot_dimension_numbers<[1], [0], [0], [1], [0, 0, 1, 1], [], []>} : vector<32x128xf32>, vector<128x128xf32>, vector<32x128xf32> -> vector<32x128xf32>
    %c2 = arith.constant 2 : index
    %c0_17 = arith.constant 0 : index
    %60 = vector.load %arg4[%c2, %c0_17] : memref<4x128xf32, #tpu.memory_space<vmem>>, vector<1x128xf32>
    %61 = vector.shape_cast %60 : vector<1x128xf32> to vector<128xf32>
    %62 = vector.shape_cast %61 : vector<128xf32> to vector<1x128xf32>
    %63 = vector.broadcast %62 : vector<1x128xf32> to vector<32x128xf32>
    %64 = arith.addf %59, %63 : vector<32x128xf32>
    %65 = math.tanh %64 : vector<32x128xf32>
    %66 = vector.shape_cast %65 : vector<32x128xf32> to vector<2x16x128xf32>
    %cst_18 = arith.constant dense<0xFF800000> : vector<2x128xf32>
    %67 = vector.multi_reduction <maximumf>, %66, %cst_18 [1] : vector<2x16x128xf32> to vector<2x128xf32>
    %c2_19 = arith.constant 2 : index
    %c0_20 = arith.constant 0 : index
    %c0_21 = arith.constant 0 : index
    %68 = vector.load %arg3[%c2_19, %c0_20, %c0_21] : memref<3x128x128xf32, #tpu.memory_space<vmem>>, vector<1x128x128xf32>
    %69 = vector.shape_cast %68 : vector<1x128x128xf32> to vector<128x128xf32>
    %cst_22 = arith.constant dense<0.000000e+00> : vector<2x128xf32>
    %70 = tpu.matmul %67, %69, %cst_22 {dimension_numbers = #tpu.dot_dimension_numbers<[1], [0], [0], [1], [0, 0, 1, 1], [], []>} : vector<2x128xf32>, vector<128x128xf32>, vector<2x128xf32> -> vector<2x128xf32>
    %c3 = arith.constant 3 : index
    %c0_23 = arith.constant 0 : index
    %71 = vector.load %arg4[%c3, %c0_23] : memref<4x128xf32, #tpu.memory_space<vmem>>, vector<1x128xf32>
    %72 = vector.shape_cast %71 : vector<1x128xf32> to vector<128xf32>
    %73 = vector.shape_cast %72 : vector<128xf32> to vector<1x128xf32>
    %74 = vector.broadcast %73 : vector<1x128xf32> to vector<2x128xf32>
    %75 = arith.addf %70, %74 : vector<2x128xf32>
    %76 = math.tanh %75 : vector<2x128xf32>
    %c0_24 = arith.constant 0 : index
    %c0_25 = arith.constant 0 : index
    %77 = vector.load %arg5[%c0_24, %c0_25] : memref<128x128xf32, #tpu.memory_space<vmem>>, vector<128x128xf32>
    %cst_26 = arith.constant dense<0.000000e+00> : vector<2x128xf32>
    %78 = tpu.matmul %76, %77, %cst_26 {dimension_numbers = #tpu.dot_dimension_numbers<[1], [0], [0], [1], [0, 0, 1, 1], [], []>} : vector<2x128xf32>, vector<128x128xf32>, vector<2x128xf32> -> vector<2x128xf32>
    %c0_27 = arith.constant 0 : index
    %c0_28 = arith.constant 0 : index
    %79 = vector.load %arg6[%c0_27, %c0_28] : memref<1x128xf32, #tpu.memory_space<vmem>>, vector<1x128xf32>
    %80 = vector.broadcast %79 : vector<1x128xf32> to vector<2x128xf32>
    %81 = arith.addf %78, %80 : vector<2x128xf32>
    %c0_29 = arith.constant 0 : index
    %c0_30 = arith.constant 0 : index
    %82 = vector.load %arg7[%c0_29, %c0_30] : memref<2x128xf32, #tpu.memory_space<vmem>>, vector<2x128xf32>
    tpu.vector_store %arg7[%c0_29, %c0_30], %81 {strides = array<i32>} : memref<2x128xf32, #tpu.memory_space<vmem>>, vector<2x128xf32>,
    return
  }
  func.func @transform_0(%arg0: i32) -> (i32, i32, i32) {
    %c0_i32 = arith.constant 0 : i32
    %c0_i32_0 = arith.constant 0 : i32
    %c0_i32_1 = arith.constant 0 : i32
    return %arg0, %c0_i32, %c0_i32_0 : i32, i32, i32
  }
  func.func @transform_1(%arg0: i32) -> (i32, i32) {
    %c0_i32 = arith.constant 0 : i32
    %c0_i32_0 = arith.constant 0 : i32
    %c0_i32_1 = arith.constant 0 : i32
    return %c0_i32, %c0_i32_0 : i32, i32
  }
  func.func @transform_2(%arg0: i32) -> (i32, i32, i32) {
    %c0_i32 = arith.constant 0 : i32
    %c0_i32_0 = arith.constant 0 : i32
    %c0_i32_1 = arith.constant 0 : i32
    %c0_i32_2 = arith.constant 0 : i32
    return %c0_i32, %c0_i32_0, %c0_i32_1 : i32, i32, i32
  }
  func.func @transform_3(%arg0: i32) -> (i32, i32) {
    %c0_i32 = arith.constant 0 : i32
    %c0_i32_0 = arith.constant 0 : i32
    %c0_i32_1 = arith.constant 0 : i32
    return %c0_i32, %c0_i32_0 : i32, i32
  }
  func.func @transform_4(%arg0: i32) -> (i32, i32) {
    %c0_i32 = arith.constant 0 : i32
    %c0_i32_0 = arith.constant 0 : i32
    %c0_i32_1 = arith.constant 0 : i32
    return %c0_i32, %c0_i32_0 : i32, i32
  }
  func.func @transform_5(%arg0: i32) -> (i32, i32) {
    %c0_i32 = arith.constant 0 : i32
    %c0_i32_0 = arith.constant 0 : i32
    %c0_i32_1 = arith.constant 0 : i32
    return %c0_i32, %c0_i32_0 : i32, i32
  }
  func.func @transform_6(%arg0: i32) -> (i32, i32) {
    %c0_i32 = arith.constant 0 : i32
    %c0_i32_0 = arith.constant 0 : i32
    return %arg0, %c0_i32 : i32, i32
  }
}

</mosaic_0001>

<bundles_post_ra>
// kernel: tpu_custom_call.1
= control target key start
LH: loop header
LB: loop body
LE: loop exit
PB: predicated region body
PF: predicated region fallthrough
CT: control target
= control target key end

     0   :  { %11 = vsyncpa [#allocation3], 0  ;;  %s634_s0 = inlined_call_operand.vmem [shape: f32[2,16,3], index: 0, kind: input, shape index: {}]   ;;  %s635_s1 = inlined_call_operand.vmem [shape: f32[3,128], index: 1, kind: input, shape index: {}]   ;;  %s636_s2 = inlined_call_operand.hbm [shape: f32[3,128,128], index: 2, kind: input, shape index: {}]   ;;  %s637_s3 = inlined_call_operand.vmem [shape: f32[4,128], index: 3, kind: input, shape index: {}]   ;;  %s638_s4 = inlined_call_operand.hbm [shape: f32[128,128], index: 4, kind: input, shape index: {}]   ;;  %s639_s5 = inlined_call_operand.vmem [shape: f32[1,128], index: 5, kind: input, shape index: {}]   ;;  %s640_s6 = inlined_call_operand.hbm [shape: f32[2,128], index: 6, kind: output, shape index: {}]  }
   0x1   :  { %12 = vsyncpa [#allocation6], 0 }
   0x2   :  { %13 = vsyncpa [#allocation4], 0  ;;  %s22_s23 = sshll.u32 %s636_s2, 4  ;;  %s552_s24 = smov [#allocation2]   ;;  %s23_s23 = int_to_ptr.hbm [resolvable:$true] %s22_s23 }
   0x3   :  { %s24_s25 = sshll.u32 %s552_s24, 4  ;;  %s37_s28 = sshll.u32 %s638_s4, 4  ;;  %s25_s25 = int_to_ptr.vmem [resolvable:$true] %s24_s25  ;;  %s38_s28 = int_to_ptr.hbm [resolvable:$true] %s37_s28 }
   0x4   :  { %s553_s29 = smov 128   ;;  %s554_s30 = smov 8  }
   0x5   :  { %30 = dma.hbm_to_vmem [thread:$0]  %s23_s23, 6144, %s25_s25, [#allocation3], %s553_s29, %s553_s29, %s554_s30  }
   0x6   :  { %s555_s7 = smov [#allocation5]  }
   0x7   :  { %s39_s8 = sshll.u32 %s555_s7, 4  ;;  %s40_s8 = int_to_ptr.vmem [resolvable:$true] %s39_s8 }
   0x8   :  { %45 = dma.hbm_to_vmem [thread:$0]  %s38_s28, 2048, %s40_s8, [#allocation6], %s553_s29, %s553_s29, %s554_s30  }
   0x9   :  { %546 = dma.done.wait [#allocation3], 6144  }
   0xa   :  { %547 = vsyncadd [#allocation3], 4294961152 }
   0xb   :  { %548 = dma.done.wait [#allocation6], 2048  }
   0xc   :  { %549 = vsyncadd [#allocation6], 4294965248  ;;  %v556_v0 = vmov 1   ;;  %v557_v1 = vmov 0   ;;  %v558_v2 = vmov 2   ;;  %vm60_vm0 = vcmask 23552  }
   0xd   :  { %435 = vset.pattern.permute.xlu1 %v556_v0  ;;  %434 = vset.pattern.permute.xlu0 %v557_v1  ;;  %v56_v3 = vld [vmem:[%s634_s0] sm:$0xff]  ;;  %v57_v4 = vld [vmem:[%s634_s0 + $0x8] sm:$0xff]  ;;  %v58_v5 = vld [vmem:[%s634_s0 + $0x10] sm:$0xff]  ;;  %vm343_vm1 = vcmask 1041409   ;;  %s559_s25 = smov [#allocation7]   ;;  %s415_s29 = sshll.u32 %s640_s6, 4  ;;  %s416_s29 = int_to_ptr.hbm [resolvable:$true] %s415_s29 }
   0xe   :  { %436 = vset.pattern.permute.xlu2 %v558_v2  ;;  %v61_v6 = vsel %vm60_vm0, %v56_v3, -inf  ;;  %v62_v7 = vsel %vm60_vm0, %v57_v4, -inf  ;;  %v59_v8 = vld [vmem:[%s634_s0 + $0x18] sm:$0xff]  ;;  %v70_v9 = vsel %vm60_vm0, %v58_v5, -inf  ;;  %v201_v30 = vld [vmem:[#allocation2 + $0x70] sm:$0xff]  ;;  %v200_v31 = vld [vmem:[#allocation2 + $0x68] sm:$0xff] }
   0xf   :  { %v63_v10 = vmax.f32 %v61_v6, %v62_v7  ;;  %v71_v11 = vsel %vm60_vm0, %v59_v8, -inf  ;;  %v202_v29 = vld [vmem:[#allocation2 + $0x78] sm:$0xff]  ;;  %v199_v32 = vld [vmem:[#allocation2 + $0x60] sm:$0xff]  ;;  %v197_v34 = vld [vmem:[#allocation2 + $0x50] sm:$0xff]  ;;  %s413_s26 = sshll.u32 %s559_s25, 4  ;;  %s414_s26 = int_to_ptr.vmem [resolvable:$true] %s413_s26 }
  0x10   :  { %v72_v12 = vmax.f32 %v70_v9, %v71_v11  ;;  %205 = vmatpush.msra.mxu0 %v202_v29  ;;  %v198_v33 = vld [vmem:[#allocation2 + $0x58] sm:$0xff]  ;;  %v196_v35 = vld [vmem:[#allocation2 + $0x48] sm:$0xff]  ;;  %v195_v36 = vld [vmem:[#allocation2 + $0x40] sm:$0xff] }
  0x11   :  { %v64_v13 = vrot.slane %v63_v10, 4  ;;  %v194_v37 = vld [vmem:[#allocation2 + $0x38] sm:$0xff]  ;;  %v83_v38 = vld [vmem:[%s635_s1] sm:$0x7]  ;;  %v193_v39 = vld [vmem:[#allocation2 + $0x30] sm:$0xff] }
  0x12   :  { %v73_v15 = vrot.slane %v72_v12, 4  ;;  %206 = vmatpush.msra.mxu0 %v201_v30  ;;  %v192_v40 = vld [vmem:[#allocation2 + $0x28] sm:$0xff]  ;;  %v125_v42 = vperm.slane %v83_v38, 1  ;;  %v104_v43 = vperm.slane %v83_v38, 0  ;;  %v191_v44 = vld [vmem:[#allocation2 + $0x20] sm:$0xff]  ;;  %v150_v45 = vperm.slane %v83_v38, 2 }
  0x13   :  { %v65_v14 = vmax.f32 %v63_v10, %v64_v13  ;;  %v190_v48 = vld [vmem:[#allocation2 + $0x18] sm:$0xff]  ;;  %v189_v51 = vld [vmem:[#allocation2 + $0x10] sm:$0xff]  ;;  %v188_v52 = vld [vmem:[#allocation2 + $0x8] sm:$0xff] }
  0x14   :  { %v74_v18 = vmax.f32 %v72_v12, %v73_v15  ;;  %207 = vmatpush.msra.mxu0 %v200_v31  ;;  %v187_v55 = vld [vmem:[#allocation2] sm:$0xff] }
  0x15   :  { %v66_v16 = vrot.slane %v65_v14, 2  ;;  %v443_v57 = vld [vmem:[%s637_s3] ss:$0 sm:$0xff] }
  0x16   :  { %v75_v21 = vrot.slane %v74_v18, 2  ;;  %208 = vmatpush.msra.mxu0 %v199_v32 }
  0x17   :  { %v67_v17 = vmax.f32 %v65_v14, %v66_v16 }
  0x18   :  { %v76_v23 = vmax.f32 %v74_v18, %v75_v21  ;;  %209 = vmatpush.msra.mxu0 %v198_v33 }
  0x19   :  { %v68_v19 = vrot.slane %v67_v17, 1 }
  0x1a   :  { %v77_v25 = vrot.slane %v76_v23, 1  ;;  %210 = vmatpush.msra.mxu0 %v197_v34 }
  0x1b   :  { %v69_v20 = vmax.f32 %v67_v17, %v68_v19 }
  0x1c   :  { %v78_v26 = vmax.f32 %v76_v23, %v77_v25  ;;  %211 = vmatpush.msra.mxu0 %v196_v35 }
  0x1d   :  { %v79_v22 = vsub.f32 %v56_v3, %v69_v20  ;;  %v80_v24 = vsub.f32 %v57_v4, %v69_v20 }
  0x1e   :  { %v81_v27 = vsub.f32 %v58_v5, %v78_v26  ;;  %v82_v28 = vsub.f32 %v59_v8, %v78_v26  ;;  %212 = vmatpush.msra.mxu0 %v195_v36 }
  0x1f   :  { %110 = vperm.xlu1 %435, %v79_v22   ;;  %86 = vperm.xlu0 %434, %v79_v22  }
  0x20   :  { %135 = vperm.xlu2 %436, %v79_v22   ;;  %213 = vmatpush.msra.mxu0 %v194_v37 }
  0x22   :  { %214 = vmatpush.msra.mxu0 %v193_v39 }
  0x24   :  { %215 = vmatpush.msra.mxu0 %v192_v40 }
  0x26   :  { %216 = vmatpush.msra.mxu0 %v191_v44  ;;  %v272_v44 = vld [vmem:[#allocation2 + $0xf8] sm:$0xff] }
  0x27   :  { %114 = vperm.xlu1 %435, %v80_v24   ;;  %91 = vperm.xlu0 %434, %v80_v24  }
  0x28   :  { %139 = vperm.xlu2 %436, %v80_v24   ;;  %217 = vmatpush.msra.mxu0 %v190_v48  ;;  %v268_v48 = vld [vmem:[#allocation2 + $0xd8] sm:$0xff] }
  0x29   :  { %275 = vmatpush.msra.mxu1 %v272_v44  ;;  %v325_v44 = vld [vmem:[#allocation2 + $0x110] sm:$0xff] }
  0x2a   :  { %218 = vmatpush.msra.mxu0 %v189_v51  ;;  %v265_v51 = vld [vmem:[#allocation2 + $0xc0] sm:$0xff] }
  0x2c   :  { %219 = vmatpush.msra.mxu0 %v188_v52  ;;  %v264_v52 = vld [vmem:[#allocation2 + $0xb8] sm:$0xff] }
  0x2e   :  { %220 = vmatpush.msra.mxu0 %v187_v55  ;;  %v261_v55 = vld [vmem:[#allocation2 + $0xa0] sm:$0xff] }
  0x2f   :  { %437 = vset.pattern.permute.xlu1 %v557_v1  ;;  %96 = vperm.xlu0 %434, %v81_v27  }
  0x30   :  { %101 = vperm.xlu1 %437, %v82_v28   ;;  %438 = vset.pattern.permute.xlu2 %v556_v0 }
  0x31   :  { %118 = vperm.xlu2 %438, %v81_v27  }
  0x37   :  { %439 = vset.pattern.permute.xlu0 %v556_v0 }
  0x38   :  { %440 = vset.pattern.permute.xlu1 %v558_v2  ;;  %122 = vperm.xlu0 %439, %v82_v28  }
  0x39   :  { %143 = vperm.xlu1 %440, %v81_v27   ;;  %441 = vset.pattern.permute.xlu2 %v558_v2 }
  0x3a   :  { %147 = vperm.xlu2 %441, %v82_v28  }
  0x40   :  { %442 = vset.pattern.permute.xlu0 %v558_v2 }
  0x7a   :  { %v136_v41 = vpop.permute.xlu2 %135 }
  0x7b   :  { %v151_v53 = vmul.f32 %v150_v45, %v136_v41 }
  0x82   :  { %v140_v56 = vpop.permute.xlu2 %139 }
  0x83   :  { %v152_v63 = vmul.f32 %v150_v45, %v140_v56  ;;  %v260_v56 = vld [vmem:[#allocation2 + $0x98] sm:$0xff] }
  0x8b   :  { %v119_v4 = vpop.permute.xlu2 %118 }
  0x8c   :  { %v128_v9 = vmul.f32 %v125_v42, %v119_v4 }
  0x91   :  { %v111_v46 = vpop.permute.xlu1 %110  ;;  %v87_v47 = vpop.permute.xlu0 %86 }
  0x92   :  { %v126_v49 = vmul.f32 %v125_v42, %v111_v46  ;;  %v105_v50 = vmul.f32 %v104_v43, %v87_v47  ;;  %v270_v46 = vld [vmem:[#allocation2 + $0xe8] sm:$0xff]  ;;  %v269_v47 = vld [vmem:[#allocation2 + $0xe0] sm:$0xff] }
  0x94   :  { %v130_v54 = vadd.f32 %v126_v49, %v105_v50  ;;  %v148_v11 = vpop.permute.xlu2 %147  ;;  %v267_v49 = vld [vmem:[#allocation2 + $0xd0] sm:$0xff]  ;;  %v266_v50 = vld [vmem:[#allocation2 + $0xc8] sm:$0xff] }
  0x95   :  { %v154_v17 = vmul.f32 %v150_v45, %v148_v11 }
  0x96   :  { %v155_v58 = vadd.f32 %v151_v53, %v130_v54  ;;  %v263_v53 = vld [vmem:[#allocation2 + $0xb0] sm:$0xff]  ;;  %v262_v54 = vld [vmem:[#allocation2 + $0xa8] sm:$0xff] }
  0x98   :  { %v161_v1 = vadd.f32 %v443_v57, %v155_v58  ;;  %v258_v58 = vld [vmem:[#allocation2 + $0x88] sm:$0xff] }
  0x99   :  { %v115_v59 = vpop.permute.xlu1 %114  ;;  %v92_v60 = vpop.permute.xlu0 %91 }
  0x9a   :  { %v127_v61 = vmul.f32 %v125_v42, %v115_v59  ;;  %v106_v62 = vmul.f32 %v104_v43, %v92_v60  ;;  %448 = vtanh.f32 %v161_v1  ;;  %v257_v60 = vld [vmem:[#allocation2 + $0x80] sm:$0xff] }
  0x9c   :  { %v131_v0 = vadd.f32 %v127_v61, %v106_v62  ;;  %v444_v61 = vld [vmem:[%s637_s3 + $0x1] ss:$0 sm:$0xff] }
  0x9e   :  { %v156_v2 = vadd.f32 %v152_v63, %v131_v0 }
  0xa0   :  { %v162_v3 = vadd.f32 %v443_v57, %v156_v2  ;;  %v449_v7 = vpop.eup %448 }
  0xa1   :  { %v97_v5 = vpop.permute.xlu0 %96 }
  0xa2   :  { %450 = vtanh.f32 %v162_v3  ;;  %v102_v6 = vpop.permute.xlu1 %101  ;;  %v107_v10 = vmul.f32 %v104_v43, %v97_v5 }
  0xa3   :  { %v108_v14 = vmul.f32 %v104_v43, %v102_v6 }
  0xa4   :  { %v132_v19 = vadd.f32 %v128_v9, %v107_v10 }
  0xa8   :  { %v451_v8 = vpop.eup %450 }
  0xa9   :  { %v169_v12 = vmax.f32 %v449_v7, %v451_v8 }
  0xaa   :  { %v123_v13 = vpop.permute.xlu0 %122 }
  0xab   :  { %v129_v15 = vmul.f32 %v125_v42, %v123_v13  ;;  %v144_v16 = vpop.permute.xlu1 %143  ;;  %v170_v18 = vrot.slane %v169_v12, 4 }
  0xac   :  { %v153_v20 = vmul.f32 %v150_v45, %v144_v16  ;;  %v271_v45 = vld [vmem:[#allocation2 + $0xf0] sm:$0xff] }
  0xad   :  { %v133_v21 = vadd.f32 %v129_v15, %v108_v14  ;;  %v171_v22 = vmax.f32 %v169_v12, %v170_v18  ;;  %276 = vmatpush.msra.mxu1 %v271_v45 }
  0xae   :  { %v157_v23 = vadd.f32 %v153_v20, %v132_v19 }
  0xaf   :  { %v158_v24 = vadd.f32 %v154_v17, %v133_v21  ;;  %v172_v25 = vrot.slane %v171_v22, 2  ;;  %277 = vmatpush.msra.mxu1 %v270_v46  ;;  %v324_v46 = vld [vmem:[#allocation2 + $0x108] sm:$0xff] }
  0xb0   :  { %v163_v26 = vadd.f32 %v443_v57, %v157_v23 }
  0xb1   :  { %v164_v27 = vadd.f32 %v443_v57, %v158_v24  ;;  %v173_v28 = vmax.f32 %v171_v22, %v172_v25  ;;  %278 = vmatpush.msra.mxu1 %v269_v47  ;;  %v259_v57 = vld [vmem:[#allocation2 + $0x90] sm:$0xff]  ;;  %v323_v47 = vld [vmem:[#allocation2 + $0x100] sm:$0xff] }
  0xb2   :  { %452 = vtanh.f32 %v163_v26 }
  0xb3   :  { %454 = vtanh.f32 %v164_v27  ;;  %v174_v29 = vrot.slane %v173_v28, 1  ;;  %279 = vmatpush.msra.mxu1 %v268_v48  ;;  %v338_v27 = vld [vmem:[#allocation2 + $0x178] sm:$0xff] }
  0xb4   :  { %346 = vmatpush.msra.mxu2 %v338_v27  ;;  %v447_v27 = vld [vmem:[%s639_s5] ss:$0 sm:$0xff] }
  0xb5   :  { %v175_v30 = vmax.f32 %v173_v28, %v174_v29  ;;  %280 = vmatpush.msra.mxu1 %v267_v49  ;;  %v337_v28 = vld [vmem:[#allocation2 + $0x170] sm:$0xff]  ;;  %v336_v29 = vld [vmem:[#allocation2 + $0x168] sm:$0xff]  ;;  %v382_v49 = vld [vmem:[#allocation5 + $0x78] sm:$0xff] }
  0xb6   :  { %347 = vmatpush.msra.mxu2 %v337_v28  ;;  %387 = vmatpush.msra.mxu3 %v382_v49 }
  0xb7   :  { %v183_v31 = vsub.f32 %v449_v7, %v175_v30  ;;  %v184_v37 = vsub.f32 %v451_v8, %v175_v30  ;;  %281 = vmatpush.msra.mxu1 %v266_v50  ;;  %v335_v30 = vld [vmem:[#allocation2 + $0x160] sm:$0xff]  ;;  %v381_v50 = vld [vmem:[#allocation5 + $0x70] sm:$0xff] }
  0xb8   :  { %v453_v32 = vpop.eup %452  ;;  %348 = vmatpush.msra.mxu2 %v336_v29  ;;  %388 = vmatpush.msra.mxu3 %v381_v50 }
  0xb9   :  { %v455_v33 = vpop.eup %454  ;;  %221 = vmatmul.f32.vlgmr.msra.gmra.mxu0 %v183_v31  ;;  %282 = vmatpush.msra.mxu1 %v265_v51  ;;  %v334_v31 = vld [vmem:[#allocation2 + $0x158] sm:$0xff] }
  0xba   :  { %v176_v34 = vmax.f32 %v453_v32, %v455_v33  ;;  %349 = vmatpush.msra.mxu2 %v335_v30 }
  0xbb   :  { %283 = vmatpush.msra.mxu1 %v264_v52  ;;  %v380_v52 = vld [vmem:[#allocation5 + $0x68] sm:$0xff] }
  0xbc   :  { %v177_v35 = vrot.slane %v176_v34, 4  ;;  %350 = vmatpush.msra.mxu2 %v334_v31  ;;  %389 = vmatpush.msra.mxu3 %v380_v52 }
  0xbd   :  { %284 = vmatpush.msra.mxu1 %v263_v53 }
  0xbe   :  { %v178_v36 = vmax.f32 %v176_v34, %v177_v35  ;;  %v331_v35 = vld [vmem:[#allocation2 + $0x140] sm:$0xff] }
  0xbf   :  { %285 = vmatpush.msra.mxu1 %v262_v54  ;;  %v379_v54 = vld [vmem:[#allocation5 + $0x60] sm:$0xff] }
  0xc0   :  { %v179_v38 = vrot.slane %v178_v36, 2  ;;  %390 = vmatpush.msra.mxu3 %v379_v54 }
  0xc1   :  { %224 = vmatmul.f32.gmra.mxu0 %v184_v37  ;;  %286 = vmatpush.msra.mxu1 %v261_v55  ;;  %v329_v37 = vld [vmem:[#allocation2 + $0x130] sm:$0xff] }
  0xc2   :  { %v180_v39 = vmax.f32 %v178_v36, %v179_v38  ;;  %v330_v36 = vld [vmem:[#allocation2 + $0x138] sm:$0xff]  ;;  %v328_v38 = vld [vmem:[#allocation2 + $0x128] sm:$0xff] }
  0xc3   :  { %287 = vmatpush.msra.mxu1 %v260_v56 }
  0xc4   :  { %v181_v40 = vrot.slane %v180_v39, 1 }
  0xc5   :  { %288 = vmatpush.msra.mxu1 %v259_v57  ;;  %v378_v57 = vld [vmem:[#allocation5 + $0x58] sm:$0xff] }
  0xc6   :  { %v182_v41 = vmax.f32 %v180_v39, %v181_v40  ;;  %v327_v39 = vld [vmem:[#allocation2 + $0x120] sm:$0xff]  ;;  %391 = vmatpush.msra.mxu3 %v378_v57 }
  0xc7   :  { %289 = vmatpush.msra.mxu1 %v258_v58  ;;  %v445_v40 = vld [vmem:[%s637_s3 + $0x2] ss:$0 sm:$0xff] }
  0xc8   :  { %v185_v42 = vsub.f32 %v453_v32, %v182_v41  ;;  %v186_v43 = vsub.f32 %v455_v33, %v182_v41  ;;  %v333_v32 = vld [vmem:[#allocation2 + $0x150] sm:$0xff]  ;;  %v332_v33 = vld [vmem:[#allocation2 + $0x148] sm:$0xff] }
  0xc9   :  { %290 = vmatpush.msra.mxu1 %v257_v60  ;;  %351 = vmatpush.msra.mxu2 %v333_v32  ;;  %v377_v60 = vld [vmem:[#allocation5 + $0x50] sm:$0xff] }
  0xca   :  { %227 = vmatmul.f32.gmra.mxu0 %v185_v42  ;;  %v326_v42 = vld [vmem:[#allocation2 + $0x118] sm:$0xff]  ;;  %392 = vmatpush.msra.mxu3 %v377_v60 }
  0xcb   :  { %352 = vmatpush.msra.mxu2 %v332_v33 }
  0xcd   :  { %353 = vmatpush.msra.mxu2 %v331_v35 }
  0xcf   :  { %354 = vmatpush.msra.mxu2 %v330_v36 }
  0xd1   :  { %355 = vmatpush.msra.mxu2 %v329_v37 }
  0xd2   :  { %230 = vmatmul.f32.gmra.mxu0 %v186_v43 }
  0xd3   :  { %356 = vmatpush.msra.mxu2 %v328_v38 }
  0xd5   :  { %357 = vmatpush.msra.mxu2 %v327_v39 }
  0xd7   :  { %358 = vmatpush.msra.mxu2 %v326_v42 }
  0xd9   :  { %359 = vmatpush.msra.mxu2 %v325_v44 }
  0xdb   :  { %360 = vmatpush.msra.mxu2 %v324_v46 }
  0xdd   :  { %361 = vmatpush.msra.mxu2 %v323_v47 }
 0x136   :  { %v222_v59 = vpop.f32.mrf.mxu0 }
 0x137   :  { %v223_v62 = vadd.f32 %v444_v61, %v222_v59 }
 0x139   :  { %456 = vtanh.f32 %v223_v62  ;;  %v376_v62 = vld [vmem:[#allocation5 + $0x48] sm:$0xff] }
 0x13a   :  { %393 = vmatpush.msra.mxu3 %v376_v62 }
 0x13e   :  { %v225_v63 = vpop.f32.mrf.mxu0 }
 0x13f   :  { %v226_v0 = vadd.f32 %v444_v61, %v225_v63  ;;  %v457_v1 = vpop.eup %456  ;;  %v375_v63 = vld [vmem:[#allocation5 + $0x40] sm:$0xff] }
 0x140   :  { %394 = vmatpush.msra.mxu3 %v375_v63 }
 0x141   :  { %458 = vtanh.f32 %v226_v0 }
 0x147   :  { %v459_v2 = vpop.eup %458  ;;  %v228_v3 = vpop.f32.mrf.mxu0 }
 0x148   :  { %v238_v4 = vmax.f32 %v457_v1, %v459_v2  ;;  %v229_v7 = vadd.f32 %v444_v61, %v228_v3 }
 0x14a   :  { %v239_v5 = vrot.slane %v238_v4, 4  ;;  %460 = vtanh.f32 %v229_v7  ;;  %v372_v7 = vld [vmem:[#allocation5 + $0x28] sm:$0xff] }
 0x14c   :  { %v240_v6 = vmax.f32 %v238_v4, %v239_v5  ;;  %v373_v4 = vld [vmem:[#allocation5 + $0x30] sm:$0xff] }
 0x14e   :  { %v241_v8 = vrot.slane %v240_v6, 2 }
 0x14f   :  { %v231_v9 = vpop.f32.mrf.mxu0 }
 0x150   :  { %v232_v10 = vadd.f32 %v444_v61, %v231_v9  ;;  %v242_v11 = vmax.f32 %v240_v6, %v241_v8  ;;  %v461_v15 = vpop.eup %460 }
 0x152   :  { %462 = vtanh.f32 %v232_v10  ;;  %v243_v12 = vrot.slane %v242_v11, 1 }
 0x154   :  { %v244_v13 = vmax.f32 %v242_v11, %v243_v12 }
 0x156   :  { %v252_v14 = vsub.f32 %v457_v1, %v244_v13  ;;  %v253_v20 = vsub.f32 %v459_v2, %v244_v13  ;;  %v374_v1 = vld [vmem:[#allocation5 + $0x38] sm:$0xff] }
 0x157   :  { %395 = vmatpush.msra.mxu3 %v374_v1 }
 0x158   :  { %v463_v16 = vpop.eup %462  ;;  %291 = vmatmul.f32.vlgmr.msra.gmra.mxu1 %v252_v14 }
 0x159   :  { %v245_v17 = vmax.f32 %v461_v15, %v463_v16  ;;  %396 = vmatpush.msra.mxu3 %v373_v4 }
 0x15b   :  { %v246_v18 = vrot.slane %v245_v17, 4  ;;  %397 = vmatpush.msra.mxu3 %v372_v7 }
 0x15d   :  { %v247_v19 = vmax.f32 %v245_v17, %v246_v18  ;;  %v371_v18 = vld [vmem:[#allocation5 + $0x20] sm:$0xff] }
 0x15e   :  { %398 = vmatpush.msra.mxu3 %v371_v18 }
 0x15f   :  { %v248_v21 = vrot.slane %v247_v19, 2 }
 0x160   :  { %294 = vmatmul.f32.gmra.mxu1 %v253_v20  ;;  %v369_v20 = vld [vmem:[#allocation5 + $0x10] sm:$0xff] }
 0x161   :  { %v249_v22 = vmax.f32 %v247_v19, %v248_v21  ;;  %v370_v19 = vld [vmem:[#allocation5 + $0x18] sm:$0xff]  ;;  %v368_v21 = vld [vmem:[#allocation5 + $0x8] sm:$0xff] }
 0x162   :  { %399 = vmatpush.msra.mxu3 %v370_v19 }
 0x163   :  { %v250_v23 = vrot.slane %v249_v22, 1 }
 0x164   :  { %400 = vmatpush.msra.mxu3 %v369_v20 }
 0x165   :  { %v251_v24 = vmax.f32 %v249_v22, %v250_v23  ;;  %v367_v22 = vld [vmem:[#allocation5] sm:$0xff] }
 0x166   :  { %401 = vmatpush.msra.mxu3 %v368_v21  ;;  %v446_v23 = vld [vmem:[%s637_s3 + $0x3] ss:$0 sm:$0xff] }
 0x167   :  { %v254_v25 = vsub.f32 %v461_v15, %v251_v24  ;;  %v255_v26 = vsub.f32 %v463_v16, %v251_v24 }
 0x168   :  { %402 = vmatpush.msra.mxu3 %v367_v22 }
 0x169   :  { %297 = vmatmul.f32.gmra.mxu1 %v254_v25 }
 0x171   :  { %300 = vmatmul.f32.gmra.mxu1 %v255_v26 }
 0x1d5   :  { %v292_v34 = vpop.f32.mrf.mxu1 }
 0x1d6   :  { %v293_v45 = vadd.f32 %v445_v40, %v292_v34 }
 0x1dd   :  { %v295_v41 = vpop.f32.mrf.mxu1 }
 0x1de   :  { %v296_v43 = vadd.f32 %v445_v40, %v295_v41 }
 0x1e0   :  { %464 = vtanh.f32 %v296_v43 }
 0x1e1   :  { %466 = vtanh.f32 %v293_v45 }
 0x1e6   :  { %v298_v48 = vpop.f32.mrf.mxu1  ;;  %v465_v51 = vpop.eup %464 }
 0x1e7   :  { %v467_v53 = vpop.eup %466  ;;  %v299_v56 = vadd.f32 %v445_v40, %v298_v48 }
 0x1e8   :  { %v308_v55 = vmax.f32 %v467_v53, %v465_v51 }
 0x1e9   :  { %468 = vtanh.f32 %v299_v56 }
 0x1ea   :  { %v309_v61 = vrot.slane %v308_v55, 4 }
 0x1ec   :  { %v310_v0 = vmax.f32 %v308_v55, %v309_v61 }
 0x1ee   :  { %v301_v58 = vpop.f32.mrf.mxu1  ;;  %v311_v6 = vrot.slane %v310_v0, 2 }
 0x1ef   :  { %v302_v59 = vadd.f32 %v445_v40, %v301_v58  ;;  %v469_v2 = vpop.eup %468 }
 0x1f0   :  { %v312_v9 = vmax.f32 %v310_v0, %v311_v6 }
 0x1f1   :  { %470 = vtanh.f32 %v302_v59 }
 0x1f2   :  { %v313_v12 = vrot.slane %v312_v9, 1 }
 0x1f4   :  { %v314_v15 = vmax.f32 %v312_v9, %v313_v12 }
 0x1f7   :  { %v471_v3 = vpop.eup %470 }
 0x1f8   :  { %v315_v5 = vmax.f32 %v469_v2, %v471_v3 }
 0x1fa   :  { %v316_v8 = vrot.slane %v315_v5, 4 }
 0x1fc   :  { %v317_v10 = vmax.f32 %v315_v5, %v316_v8 }
 0x1fe   :  { %v318_v11 = vrot.slane %v317_v10, 2 }
 0x200   :  { %v319_v13 = vmax.f32 %v317_v10, %v318_v11 }
 0x202   :  { %v320_v14 = vrot.slane %v319_v13, 1 }
 0x204   :  { %v321_v16 = vmax.f32 %v319_v13, %v320_v14 }
 0x206   :  { %v344_v17 = vsel %vm343_vm1, %v321_v16, %v314_v15 }
 0x207   :  { %362 = vmatmul.f32.vlgmr.msra.gmra.mxu2 %v344_v17 }
 0x28a   :  { %v363_v24 = vpop.f32.mrf.mxu2 }
 0x28b   :  { %v364_v25 = vadd.f32 %v446_v23, %v363_v24 }
 0x28d   :  { %472 = vtanh.f32 %v364_v25 }
 0x293   :  { %v473_v26 = vpop.eup %472 }
 0x294   :  { %403 = vmatmul.f32.vlgmr.msra.gmra.mxu3 %v473_v26 }
 0x317   :  { %v404_v28 = vpop.f32.mrf.mxu3 }
 0x318   :  { %v405_v29 = vadd.f32 %v447_v27, %v404_v28 }
 0x31a   :  { %407 = vst [vmem:[#allocation7] sm:$0x3] %v405_v29 }
 0x31b   :  { %418 = dma.vmem_to_hbm [thread:$0]  %s414_s26, 32, %s416_s29, [#allocation4]  }
 0x31c   :  { %550 = dma.done.wait [#allocation4], 32  }
 0x31d   :  { %551 = vsyncadd [#allocation4], 4294967264 }
 0x31e   :  { %423 = vsyncpa [#allocation3], 1 }
 0x31f   :  { %424 = vsyncpa [#allocation6], 1 }
 0x320   :  { %425 = vsyncpa [#allocation4], 1 }

</bundles_post_ra>
